<compile_context>
chip_gen: v6e
topology: v6e:2x2x1
jax: 0.10.0
libtpu: 0.0.40
codegen_flags: <defaults>
</compile_context>

<pallas_src>
import functools

import jax
import jax.numpy as jnp
from jax.experimental import pallas as pl
from jax.experimental.pallas import tpu as pltpu


# ----------------------------------------------------------------------------
# Synthetic FLAGS (the original code reads a global FLAGS object).
# ----------------------------------------------------------------------------
class FLAGS:
    width_mult_list = [0.5, 1.0]
    depth_mult_list = [0.5, 1.0]
    depth_mult_range = [0.5, 1.0]
    resolution_list = [192, 224]


EPS = 1e-5


# ----------------------------------------------------------------------------
# Pallas kernel: training-mode BatchNorm2d on a (N, C_TILE, H*W) channel slab.
# ----------------------------------------------------------------------------
def _bn_kernel(x_ref, gamma_ref, beta_ref, o_ref, *, inv_l):
    x = x_ref[...]                                   # (N, Ct, HW), input dtype
    xf = x.astype(jnp.float32)                       # no-op for f32 inputs

    # One pass over the data: per-channel sum and sum-of-squares.
    # Reduce the lane axis (HW) first, then the small N axis.
    s = jnp.sum(xf, axis=2, keepdims=True)           # (N, Ct, 1)
    s = jnp.sum(s, axis=0, keepdims=True)            # (1, Ct, 1)
    ss = jnp.sum(xf * xf, axis=2, keepdims=True)     # (N, Ct, 1)
    ss = jnp.sum(ss, axis=0, keepdims=True)          # (1, Ct, 1)

    mean = s * inv_l                                 # (1, Ct, 1)
    var = ss * inv_l - mean * mean                   # biased (training) variance
    inv_std = jax.lax.rsqrt(var + EPS)               # EUP

    # Fold the affine into fused scale/shift: y = x * scale + shift.
    gamma = gamma_ref[...]                           # (1, Ct, 1), f32
    beta = beta_ref[...]                             # (1, Ct, 1), f32
    scale = gamma * inv_std
    shift = beta - mean * scale

    o_ref[...] = (xf * scale + shift).astype(o_ref.dtype)


def _pick_c_tile(n, c, hw, itemsize):
    """Channel tile: a multiple of 8 dividing C (sublane alignment), sized so
    the double-buffered in+out blocks stay at a few MiB of VMEM each.  Falls
    back to full C when C is not a multiple of 8 (block == full array dim)."""
    if c % 8 != 0:
        return c
    budget = 2 * 1024 * 1024   # ~2 MiB/block -> ~8 MiB with 2x (in + out) buffers
    for cand in (512, 256, 128, 64, 32, 16, 8):
        if c % cand == 0 and n * cand * hw * itemsize <= budget:
            return cand
    return 8


def _batchnorm2d_pallas(x_nchw, gamma, beta):
    """x_nchw: [N, C, H, W]; gamma/beta: [C]. Training-mode BN (batch stats)."""
    n, c, h, w = x_nchw.shape
    hw = h * w
    l = n * hw

    # Free, contiguous reshape (no transpose, no extra HBM pass).
    x3 = x_nchw.reshape(n, c, hw)
    gamma3 = gamma.reshape(1, c, 1).astype(jnp.float32)
    beta3 = beta.reshape(1, c, 1).astype(jnp.float32)

    c_tile = _pick_c_tile(n, c, hw, x_nchw.dtype.itemsize)
    grid = (c // c_tile,)

    # TODO(synk): for very large N*H*W per channel slab (v7x has only 64 MiB
    # VMEM), add an L-streamed two-pass variant (sum/sumsq scratch accumulators
    # over an "arbitrary" L axis, then a normalize pass).

    kernel = functools.partial(_bn_kernel, inv_l=1.0 / l)
    y3 = pl.pallas_call(
        kernel,
        out_shape=jax.ShapeDtypeStruct((n, c, hw), x_nchw.dtype),
        grid=grid,
        in_specs=[
            pl.BlockSpec((n, c_tile, hw), lambda ci: (0, ci, 0)),
            pl.BlockSpec((1, c_tile, 1), lambda ci: (0, ci, 0)),
            pl.BlockSpec((1, c_tile, 1), lambda ci: (0, ci, 0)),
        ],
        out_specs=pl.BlockSpec((n, c_tile, hw), lambda ci: (0, ci, 0)),
        compiler_params=pltpu.CompilerParams(
            dimension_semantics=("parallel",),
            vmem_limit_bytes=32 * 1024 * 1024,
        ),
    )(x3, gamma3, beta3)

    return y3.reshape(n, c, h, w)


# ----------------------------------------------------------------------------
# SwitchableBatchNorm2d: parameter bank + index selection (glue), BN in Pallas.
# ----------------------------------------------------------------------------
class SwitchableBatchNorm2d:
    def __init__(self, num_features_list, key):
        self.num_features_list = num_features_list
        self.num_features = max(num_features_list)
        # Same flat list / construction order as the PyTorch module.
        self.bn_params = []
        k = key
        for _r in range(len(FLAGS.resolution_list)):
            for _d in range(len(FLAGS.depth_mult_range)):
                for i in num_features_list:
                    k, kg, kb = jax.random.split(k, 3)
                    gamma = 1.0 + 0.1 * jax.random.normal(kg, (i,), jnp.float32)
                    beta = 0.1 * jax.random.normal(kb, (i,), jnp.float32)
                    # TODO(synk): running_mean/running_var exist in BatchNorm2d but
                    # are unused in the training-mode forward reproduced here.
                    self.bn_params.append((gamma, beta))
        self.width_mult = max(FLAGS.width_mult_list)
        self.depth_mult = max(FLAGS.depth_mult_list)
        self.res = max(FLAGS.resolution_list)
        self.ignore_model_profiling = True

    def _selected_index(self):
        # Exact index formula from the original module's forward().
        idx = FLAGS.width_mult_list.index(self.width_mult)
        dpx = FLAGS.depth_mult_list.index(self.depth_mult)
        resid = FLAGS.resolution_list.index(self.res)
        return idx + len(FLAGS.width_mult_list) * dpx + len(FLAGS.resolution_list) * resid

    def __call__(self, x_nchw):
        gamma, beta = self.bn_params[self._selected_index()]
        assert gamma.shape[0] == x_nchw.shape[1], "selected BN channels must match input"
        return _batchnorm2d_pallas(x_nchw, gamma, beta)


# ----------------------------------------------------------------------------
# Pure-JAX reference for a sanity check.
# ----------------------------------------------------------------------------
def _bn_ref(x, gamma, beta):
    mean = jnp.mean(x, axis=(0, 2, 3), keepdims=True)
    var = jnp.mean((x - mean) ** 2, axis=(0, 2, 3), keepdims=True)
    return (x - mean) / jnp.sqrt(var + EPS) * gamma.reshape(1, -1, 1, 1) + \
        beta.reshape(1, -1, 1, 1)


if __name__ == "__main__":
    key = jax.random.PRNGKey(0)
    k_x, k_p = jax.random.split(key)

    # With num_features_list = [2, 4], the module's selected index (max width /
    # depth / resolution) lands on a 4-channel BN, so C = 4 matches directly.
    num_features_list = [2, 4]
    N, C, H, W = 2, 4, 16, 16

    x = jax.random.normal(k_x, (N, C, H, W), jnp.float32)

    module = SwitchableBatchNorm2d(num_features_list, k_p)

    y = module(x)
    y = jax.block_until_ready(y)

    gamma, beta = module.bn_params[module._selected_index()]
    y_ref = _bn_ref(x, gamma, beta)
    assert y.shape == (N, C, H, W)
    assert jnp.max(jnp.abs(y - y_ref)) < 2e-4, "mismatch vs reference"

    print("KERNEL_OK")
</pallas_src>

<mosaic_0001>
module attributes {stable_mosaic.version = 11 : i64} {
  func.func @_bn_kernel(%arg0: i32, %arg1: memref<2x4x256xf32, #tpu.memory_space<vmem>>, %arg2: memref<1x4x1xf32, #tpu.memory_space<vmem>>, %arg3: memref<1x4x1xf32, #tpu.memory_space<vmem>>, %arg4: memref<2x4x256xf32, #tpu.memory_space<vmem>>) attributes {dimension_semantics = [#tpu.dimension_semantics<parallel>], iteration_bounds = array<i64: 1>, scalar_prefetch = 0 : i64, scratch_operands = 0 : i64, tpu.core_type = #tpu.core_type<tc>, window_params = [{transform_indices = @transform_0, window_bounds = array<i64: 2, 4, 256>}, {transform_indices = @transform_1, window_bounds = array<i64: 1, 4, 1>}, {transform_indices = @transform_2, window_bounds = array<i64: 1, 4, 1>}, {transform_indices = @transform_3, window_bounds = array<i64: 2, 4, 256>}]} {
    %c0 = arith.constant 0 : index
    %c0_0 = arith.constant 0 : index
    %c0_1 = arith.constant 0 : index
    %0 = vector.load %arg1[%c0, %c0_0, %c0_1] : memref<2x4x256xf32, #tpu.memory_space<vmem>>, vector<2x4x256xf32>
    %cst = arith.constant dense<0.000000e+00> : vector<2x4xf32>
    %1 = vector.multi_reduction <add>, %0, %cst [2] : vector<2x4x256xf32> to vector<2x4xf32>
    %2 = vector.shape_cast %1 : vector<2x4xf32> to vector<2x4x1xf32>
    %cst_2 = arith.constant dense<0.000000e+00> : vector<4x1xf32>
    %3 = vector.multi_reduction <add>, %2, %cst_2 [0] : vector<2x4x1xf32> to vector<4x1xf32>
    %4 = vector.shape_cast %3 : vector<4x1xf32> to vector<1x4x1xf32>
    %5 = arith.mulf %0, %0 : vector<2x4x256xf32>
    %cst_3 = arith.constant dense<0.000000e+00> : vector<2x4xf32>
    %6 = vector.multi_reduction <add>, %5, %cst_3 [2] : vector<2x4x256xf32> to vector<2x4xf32>
    %7 = vector.shape_cast %6 : vector<2x4xf32> to vector<2x4x1xf32>
    %cst_4 = arith.constant dense<0.000000e+00> : vector<4x1xf32>
    %8 = vector.multi_reduction <add>, %7, %cst_4 [0] : vector<2x4x1xf32> to vector<4x1xf32>
    %9 = vector.shape_cast %8 : vector<4x1xf32> to vector<1x4x1xf32>
    %cst_5 = arith.constant 0.001953125 : f32
    %10 = vector.broadcast %cst_5 : f32 to vector<1x4x1xf32>
    %11 = arith.mulf %4, %10 : vector<1x4x1xf32>
    %cst_6 = arith.constant 0.001953125 : f32
    %12 = vector.broadcast %cst_6 : f32 to vector<1x4x1xf32>
    %13 = arith.mulf %9, %12 : vector<1x4x1xf32>
    %14 = arith.mulf %11, %11 : vector<1x4x1xf32>
    %15 = arith.subf %13, %14 : vector<1x4x1xf32>
    %cst_7 = arith.constant 9.99999974E-6 : f32
    %16 = vector.broadcast %cst_7 : f32 to vector<1x4x1xf32>
    %17 = arith.addf %15, %16 : vector<1x4x1xf32>
    %18 = math.rsqrt %17 : vector<1x4x1xf32>
    %c0_8 = arith.constant 0 : index
    %c0_9 = arith.constant 0 : index
    %c0_10 = arith.constant 0 : index
    %19 = vector.load %arg2[%c0_8, %c0_9, %c0_10] : memref<1x4x1xf32, #tpu.memory_space<vmem>>, vector<1x4x1xf32>
    %c0_11 = arith.constant 0 : index
    %c0_12 = arith.constant 0 : index
    %c0_13 = arith.constant 0 : index
    %20 = vector.load %arg3[%c0_11, %c0_12, %c0_13] : memref<1x4x1xf32, #tpu.memory_space<vmem>>, vector<1x4x1xf32>
    %21 = arith.mulf %19, %18 : vector<1x4x1xf32>
    %22 = arith.mulf %11, %21 : vector<1x4x1xf32>
    %23 = arith.subf %20, %22 : vector<1x4x1xf32>
    %24 = vector.broadcast %21 : vector<1x4x1xf32> to vector<2x4x256xf32>
    %25 = arith.mulf %0, %24 : vector<2x4x256xf32>
    %26 = vector.broadcast %23 : vector<1x4x1xf32> to vector<2x4x256xf32>
    %27 = arith.addf %25, %26 : vector<2x4x256xf32>
    %c0_14 = arith.constant 0 : index
    %c0_15 = arith.constant 0 : index
    %c0_16 = arith.constant 0 : index
    %28 = vector.load %arg4[%c0_14, %c0_15, %c0_16] : memref<2x4x256xf32, #tpu.memory_space<vmem>>, vector<2x4x256xf32>
    tpu.vector_store %arg4[%c0_14, %c0_15, %c0_16], %27 {strides = array<i32>} : memref<2x4x256xf32, #tpu.memory_space<vmem>>, vector<2x4x256xf32>,
    return
  }
  func.func @transform_0(%arg0: i32) -> (i32, i32, i32) {
    %c0_i32 = arith.constant 0 : i32
    %c0_i32_0 = arith.constant 0 : i32
    %c0_i32_1 = arith.constant 0 : i32
    return %c0_i32, %arg0, %c0_i32_0 : i32, i32, i32
  }
  func.func @transform_1(%arg0: i32) -> (i32, i32, i32) {
    %c0_i32 = arith.constant 0 : i32
    %c0_i32_0 = arith.constant 0 : i32
    %c0_i32_1 = arith.constant 0 : i32
    return %c0_i32, %arg0, %c0_i32_0 : i32, i32, i32
  }
  func.func @transform_2(%arg0: i32) -> (i32, i32, i32) {
    %c0_i32 = arith.constant 0 : i32
    %c0_i32_0 = arith.constant 0 : i32
    %c0_i32_1 = arith.constant 0 : i32
    return %c0_i32, %arg0, %c0_i32_0 : i32, i32, i32
  }
  func.func @transform_3(%arg0: i32) -> (i32, i32, i32) {
    %c0_i32 = arith.constant 0 : i32
    %c0_i32_0 = arith.constant 0 : i32
    %c0_i32_1 = arith.constant 0 : i32
    return %c0_i32, %arg0, %c0_i32_0 : i32, i32, i32
  }
}

</mosaic_0001>

<bundles_post_ra>
// kernel: tpu_custom_call.1
= control target key start
LH: loop header
LB: loop body
LE: loop exit
PB: predicated region body
PF: predicated region fallthrough
CT: control target
= control target key end

     0   :  { %8 = vsyncpa [#allocation3], 0  ;;  %s242_s0 = inlined_call_operand.hbm [shape: f32[2,4,256], index: 0, kind: input, shape index: {}]   ;;  %s243_s1 = inlined_call_operand.vmem [shape: f32[1,4,1], index: 1, kind: input, shape index: {}]   ;;  %s244_s2 = inlined_call_operand.vmem [shape: f32[1,4,1], index: 2, kind: input, shape index: {}]   ;;  %s245_s3 = inlined_call_operand.hbm [shape: f32[2,4,256], index: 3, kind: output, shape index: {}]  }
   0x1   :  { %9 = vsyncpa [#allocation4], 0  ;;  %s186_s12 = smov [#allocation2]  }
   0x2   :  { %s15_s13 = sshll.u32 %s186_s12, 4  ;;  %s16_s13 = int_to_ptr.vmem [resolvable:$true] %s15_s13 }
   0x3   :  { %s150_s14 = scalar_lea.vmem %s16_s13, 256  ;;  %p155_p1 = scmp.lt.s32.totalorder %s16_s13, %s16_s13 }
   0x4   :  { %p151_p0 = scmp.ne.s32.totalorder %s16_s13, %s150_s14  ;;  %p156_p2 = scmp.lt.s32.totalorder %s150_s14, %s150_s14 }
   0x6   :  { %p157_p3 = por %p156_p2, %p155_p1 }
   0x8   :  { %p158_p4 = pnand %p157_p3, %p151_p0 }
   0xa   :  { %161 = shalt.err (!%p158_p4)
}
   0xb   :  { %s187_s15 = smov 128   ;;  %s188_s16 = smov 8  }
   0xc   :  { %21 = dma.hbm_to_vmem [thread:$0]  %s242_s0, 256, %s16_s13, [#allocation3], %s187_s15, %s187_s15, %s188_s16  }
   0xd   :  { %182 = dma.done.wait [#allocation3], 256  }
   0xe   :  { %183 = vsyncadd [#allocation3], 4294967040  ;;  %vm37_vm0 = vcmask 1043456   ;;  %v29_v0 = vld [vmem:[#allocation2] sm:$0xff]  ;;  %v30_v1 = vld [vmem:[#allocation2 + $0x8] sm:$0xff]  ;;  %v189_v20 = vmov 0   ;;  %v90_v44 = vlaneseq }
   0xf   :  { %v33_v2 = vcombine.high %v29_v0, %v29_v0  ;;  %v38_v3 = vsel %vm37_vm0, %v29_v0, 0.0  ;;  %v51_v4 = vmul.f32 %v29_v0, %v29_v0  ;;  %v34_v5 = vcombine.high %v30_v1, %v30_v1  ;;  %136 = vset.pattern.permute.xlu0 %v189_v20  ;;  %137 = vset.pattern.permute.xlu1 %v189_v20  ;;  %v78_v36 = vld [vmem:[%s243_s1] sm:$0xf]  ;;  %s191_s1 = smov [#allocation5]  }
  0x10   :  { %v43_v6 = vsel %vm37_vm0, %v30_v1, 0.0  ;;  %v52_v7 = vmul.f32 %v30_v1, %v30_v1  ;;  %v79_v39 = vld [vmem:[%s244_s2] sm:$0xf]  ;;  %v190_v42 = vmov 839922192   ;;  %v91_v46 = vshrl.u32 %v90_v44, 7 }
  0x11   :  { %v39_v8 = vsel %vm37_vm0, %v33_v2, 0.0  ;;  %v55_v9 = vcombine.high %v51_v4, %v51_v4  ;;  %v59_v10 = vsel %vm37_vm0, %v51_v4, 0.0  ;;  %v44_v11 = vsel %vm37_vm0, %v34_v5, 0.0  ;;  %s118_s22 = sshll.u32 %s191_s1, 4  ;;  %s119_s22 = int_to_ptr.vmem [resolvable:$true] %s118_s22 }
  0x12   :  { %v40_v12 = vadd.f32 %v39_v8, %v38_v3  ;;  %v56_v13 = vcombine.high %v52_v7, %v52_v7  ;;  %v64_v15 = vsel %vm37_vm0, %v52_v7, 0.0  ;;  %v45_v17 = vadd.f32 %v44_v11, %v43_v6  ;;  %s162_s2 = scalar_lea.vmem %s119_s22, 256  ;;  %p167_p6 = scmp.lt.s32.totalorder %s119_s22, %s119_s22 }
  0x13   :  { %v60_v14 = vsel %vm37_vm0, %v55_v9, 0.0  ;;  %v88_v43 = vunpack.c.l.s4 %v190_v42  ;;  %p163_p5 = scmp.ne.s32.totalorder %s119_s22, %s162_s2  ;;  %p168_p7 = scmp.lt.s32.totalorder %s162_s2, %s162_s2 }
  0x14   :  { %41 = vadd.xlane.f32.xlu0 %v40_v12  ;;  %v61_v16 = vadd.f32 %v60_v14, %v59_v10  ;;  %v65_v18 = vsel %vm37_vm0, %v56_v13, 0.0 }
  0x15   :  { %v66_v19 = vadd.f32 %v65_v18, %v64_v15  ;;  %v89_v45 = vunpack.c.0.s8 %v88_v43  ;;  %p169_p8 = por %p168_p7, %p167_p6 }
  0x16   :  { %62 = vadd.xlane.f32.xlu1 %v61_v16 }
  0x17   :  { %v92_v47 = vsub.s32 %v89_v45, %v91_v46  ;;  %p170_p9 = pnand %p169_p8, %p163_p5 }
  0x18   :  { %46 = vadd.xlane.f32.xlu0 %v45_v17 }
  0x1a   :  { %67 = vadd.xlane.f32.xlu1 %v66_v19 }
  0x9d   :  { %v42_v21 = vpop.xlane.xlu0 %41 }
  0x9e   :  { %v48_v24 = vsel %vm37_vm0, %v42_v21, 0.0 }
  0x9f   :  { %v63_v22 = vpop.xlane.xlu1 %62 }
  0xa0   :  { %v69_v28 = vsel %vm37_vm0, %v63_v22, 0.0 }
  0xa1   :  { %v47_v23 = vpop.xlane.xlu0 %46 }
  0xa2   :  { %v49_v25 = vsel %vm37_vm0, %v47_v23, 0.0 }
  0xa3   :  { %v50_v26 = vadd.f32 %v49_v25, %v48_v24  ;;  %v68_v27 = vpop.xlane.xlu1 %67 }
  0xa4   :  { %v70_v29 = vsel %vm37_vm0, %v68_v27, 0.0 }
  0xa5   :  { %v72_v30 = vmul.f32 0.001953125, %v50_v26  ;;  %v71_v31 = vadd.f32 %v70_v29, %v69_v28 }
  0xa7   :  { %v74_v32 = vmul.f32 %v72_v30, %v72_v30  ;;  %v73_v33 = vmul.f32 0.001953125, %v71_v31 }
  0xa9   :  { %v75_v34 = vsub.f32 %v73_v33, %v74_v32 }
  0xab   :  { %v76_v35 = vadd.f32 1e-05, %v75_v34 }
  0xad   :  { %140 = vrsqrt.f32 %v76_v35 }
  0xba   :  { %v141_v37 = vpop.eup %140 }
  0xbb   :  { %v80_v38 = vmul.f32 %v141_v37, %v78_v36 }
  0xbd   :  { %85 = vperm.xlu0 %136, %v80_v38   ;;  %v81_v40 = vmul.f32 %v80_v38, %v72_v30 }
  0xbf   :  { %v82_v41 = vsub.f32 %v79_v39, %v81_v40 }
  0xc1   :  { %99 = vperm.xlu1 %137, %v82_v41  }
 0x138   :  { %v86_v48 = vpop.permute.xlu0 %85 }
 0x139   :  { %v93_v49 = vrot.slane %v86_v48, %v92_v47 }
 0x13b   :  { %v95_v51 = vmul.f32 %v93_v49, %v29_v0  ;;  %v96_v52 = vmul.f32 %v93_v49, %v30_v1 }
 0x13c   :  { %v100_v50 = vpop.permute.xlu1 %99 }
 0x13d   :  { %v107_v53 = vrot.slane %v100_v50, %v92_v47 }
 0x13f   :  { %v109_v54 = vadd.f32 %v107_v53, %v95_v51  ;;  %v110_v55 = vadd.f32 %v107_v53, %v96_v52 }
 0x141   :  { %111 = vst [vmem:[#allocation5] sm:$0xff] %v109_v54  ;;  %112 = vst [vmem:[#allocation5 + $0x8] sm:$0xff] %v110_v55 }
 0x142   :  { %173 = shalt.err (!%p170_p9)
}
 0x143   :  { %124 = dma.vmem_to_hbm [thread:$0]  %s119_s22, 256, %s245_s3, [#allocation4], %s187_s15, %s187_s15, %s188_s16  }
 0x144   :  { %184 = dma.done.wait [#allocation4], 256  }
 0x145   :  { %185 = vsyncadd [#allocation4], 4294967040 }
 0x146   :  { %128 = vsyncpa [#allocation3], 1 }
 0x147   :  { %129 = vsyncpa [#allocation4], 1 }

</bundles_post_ra>
